<compile_context>
chip_gen: v6e
topology: v6e:2x2x1
jax: 0.10.0
libtpu: 0.0.40
codegen_flags: <defaults>
</compile_context>

<pallas_src>
import jax
import jax.numpy as jnp
from jax.experimental import pallas as pl
from jax.experimental.pallas import tpu as pltpu

_CLAMP_MIN = 1e-05
_CLAMP_MAX = 1e06


def _mean_act_kernel(x_ref, o_ref):
    # Load in native dtype, compute exp/clamp in f32 (EUP exp), cast back.
    x = x_ref[...].astype(jnp.float32)
    o_ref[...] = jnp.clip(jnp.exp(x), _CLAMP_MIN, _CLAMP_MAX).astype(o_ref.dtype)


def _largest_lane_divisor(total, max_lanes=2048):
    """Largest multiple-of-128 divisor of `total` that is <= max_lanes (0 if none)."""
    best = 0
    w = 128
    while w <= min(total, max_lanes):
        if total % w == 0:
            best = w
        w += 128
    return best


def mean_act(x, *, max_tile_bytes=2 * 1024 * 1024, min_grid_steps=8):
    """Pallas implementation of MeanAct.forward: clamp(exp(x), 1e-5, 1e6)."""
    orig_shape = x.shape
    orig_dtype = x.dtype
    total = int(x.size)
    itemsize = jnp.dtype(orig_dtype).itemsize

    if total == 0:
        return x

    # ---- lane-dense 2-D view -----------------------------------------------
    # Elementwise op: any reshape is legal.  Always present a trailing dim that
    # is a multiple of 128 so stores are unmasked full-lane `vst`.
    x_flat = x.reshape(-1)
    n = _largest_lane_divisor(total)
    if n == 0:
        # No multiple-of-128 divisor: pad the flat array up to a 128-multiple
        # width and slice the result afterwards (cheap copy vs masked stores).
        n = min(1024, ((total + 127) // 128) * 128)
        padded_total = ((total + n - 1) // n) * n
        x_flat = jnp.pad(x_flat, (0, padded_total - total))
    else:
        padded_total = total
    m = padded_total // n
    x2 = x_flat.reshape(m, n)

    # ---- tile rows: ~1-2 MiB tiles AND at least ~min_grid_steps grid steps --
    row_bytes = n * itemsize
    if m <= 8:
        tile_m = m                                    # full-dim block (legal)
    else:
        rows_budget = max(8, (max_tile_bytes // row_bytes) // 8 * 8)
        rows_split = max(8, (m // min_grid_steps) // 8 * 8)
        tile_m = min(m, rows_budget, rows_split)      # multiple of 8 or == m
    grid = (pl.cdiv(m, tile_m),)                      # ragged tail -> masked block

    # VMEM in flight: double-buffered input + output (~4x tile) plus f32
    # temporaries / compiler scratch margin.  Cap well under v7x's 64 MiB.
    tile_bytes = tile_m * row_bytes
    vmem_limit = int(min(32 << 20, max(8 << 20, 8 * tile_bytes)))

    cost = pl.CostEstimate(
        flops=2 * padded_total,                 # clamp: cmp+select per element
        transcendentals=padded_total,           # one exp per element
        bytes_accessed=2 * padded_total * itemsize,
    )

    out2 = pl.pallas_call(
        _mean_act_kernel,
        out_shape=jax.ShapeDtypeStruct((m, n), orig_dtype),
        grid_spec=pltpu.PrefetchScalarGridSpec(
            num_scalar_prefetch=0,
            grid=grid,
            in_specs=[pl.BlockSpec((tile_m, n), lambda i: (i, 0))],
            out_specs=pl.BlockSpec((tile_m, n), lambda i: (i, 0)),
        ),
        compiler_params=pltpu.CompilerParams(
            dimension_semantics=("parallel",),   # independent tiles (v7x 2-TC)
            vmem_limit_bytes=vmem_limit,
        ),
        cost_estimate=cost,
    )(x2)

    out_flat = out2.reshape(-1)
    if padded_total != total:
        out_flat = out_flat[:total]
    return out_flat.reshape(orig_shape)


# ---------------------------------------------------------------------------
# Pure-JAX reference for a sanity check.
# ---------------------------------------------------------------------------
def _mean_act_ref(x):
    return jnp.clip(jnp.exp(x.astype(jnp.float32)), _CLAMP_MIN, _CLAMP_MAX).astype(
        x.dtype
    )


if __name__ == "__main__":
    key = jax.random.PRNGKey(0)

    # Case 1: small activation tensor, total divisible by 128 (no-pad path).
    shape1 = (2, 4, 16, 16)
    k1, k2 = jax.random.split(key)
    x1 = jax.random.normal(k1, shape1, dtype=jnp.float32) * 8.0  # hits both clamps

    out1 = jax.block_until_ready(mean_act(x1))
    ref1 = _mean_act_ref(x1)
    assert out1.shape == x1.shape and out1.dtype == x1.dtype
    assert bool(jnp.all(jnp.isfinite(out1)))
    assert bool(jnp.all(out1 >= _CLAMP_MIN)) and bool(jnp.all(out1 <= _CLAMP_MAX))
    assert jnp.allclose(out1, ref1, rtol=1e-6, atol=1e-6), (
        float(jnp.max(jnp.abs(out1 - ref1)))
    )

    # Case 2: total NOT divisible by 128 -> exercises the pad-and-slice path.
    shape2 = (3, 7, 13)
    x2 = jax.random.normal(k2, shape2, dtype=jnp.float32) * 8.0

    out2 = jax.block_until_ready(mean_act(x2))
    ref2 = _mean_act_ref(x2)
    assert out2.shape == x2.shape and out2.dtype == x2.dtype
    assert bool(jnp.all(jnp.isfinite(out2)))
    assert bool(jnp.all(out2 >= _CLAMP_MIN)) and bool(jnp.all(out2 <= _CLAMP_MAX))
    assert jnp.allclose(out2, ref2, rtol=1e-6, atol=1e-6), (
        float(jnp.max(jnp.abs(out2 - ref2)))
    )

    print("KERNEL_OK")
</pallas_src>

<mosaic_0001>
module attributes {stable_mosaic.version = 11 : i64} {
  func.func @_mean_act_kernel(%arg0: i32, %arg1: memref<1x2048xf32, #tpu.memory_space<vmem>>, %arg2: memref<1x2048xf32, #tpu.memory_space<vmem>>) attributes {dimension_semantics = [#tpu.dimension_semantics<parallel>], iteration_bounds = array<i64: 1>, scalar_prefetch = 0 : i64, scratch_operands = 0 : i64, tpu.core_type = #tpu.core_type<tc>, window_params = [{transform_indices = @transform_0, window_bounds = array<i64: 1, 2048>}, {transform_indices = @transform_1, window_bounds = array<i64: 1, 2048>}]} {
    %c0 = arith.constant 0 : index
    %c0_0 = arith.constant 0 : index
    %0 = vector.load %arg1[%c0, %c0_0] : memref<1x2048xf32, #tpu.memory_space<vmem>>, vector<1x2048xf32>
    %1 = math.exp %0 : vector<1x2048xf32>
    %cst = arith.constant 9.99999974E-6 : f32
    %cst_1 = arith.constant 1.000000e+06 : f32
    %2 = vector.broadcast %cst : f32 to vector<1x2048xf32>
    %3 = arith.maximumf %2, %1 : vector<1x2048xf32>
    %4 = vector.broadcast %cst_1 : f32 to vector<1x2048xf32>
    %5 = arith.minimumf %4, %3 : vector<1x2048xf32>
    %c0_2 = arith.constant 0 : index
    %c0_3 = arith.constant 0 : index
    %6 = vector.load %arg2[%c0_2, %c0_3] : memref<1x2048xf32, #tpu.memory_space<vmem>>, vector<1x2048xf32>
    tpu.vector_store %arg2[%c0_2, %c0_3], %5 {strides = array<i32>} : memref<1x2048xf32, #tpu.memory_space<vmem>>, vector<1x2048xf32>,
    return
  }
  func.func @transform_0(%arg0: i32) -> (i32, i32) {
    %c0_i32 = arith.constant 0 : i32
    %c0_i32_0 = arith.constant 0 : i32
    return %arg0, %c0_i32 : i32, i32
  }
  func.func @transform_1(%arg0: i32) -> (i32, i32) {
    %c0_i32 = arith.constant 0 : i32
    %c0_i32_0 = arith.constant 0 : i32
    return %arg0, %c0_i32 : i32, i32
  }
}

</mosaic_0001>

<bundles_post_ra>
// kernel: tpu_custom_call.1
= control target key start
LH: loop header
LB: loop body
LE: loop exit
PB: predicated region body
PF: predicated region fallthrough
CT: control target
= control target key end

     0   :  { %6 = vsyncpa [#allocation3], 0  ;;  %s116_s0 = inlined_call_operand.hbm [shape: f32[1,2048], index: 0, kind: input, shape index: {}]   ;;  %s117_s1 = inlined_call_operand.hbm [shape: f32[1,2048], index: 1, kind: output, shape index: {}]  }
   0x1   :  { %7 = vsyncpa [#allocation4], 0  ;;  %s98_s6 = smov [#allocation2]  }
   0x2   :  { %s14_s7 = sshll.u32 %s98_s6, 4  ;;  %s15_s7 = int_to_ptr.vmem [resolvable:$true] %s14_s7 }
   0x3   :  { %s62_s8 = scalar_lea.vmem %s15_s7, 256  ;;  %p67_p1 = scmp.lt.s32.totalorder %s15_s7, %s15_s7 }
   0x4   :  { %p63_p0 = scmp.ne.s32.totalorder %s15_s7, %s62_s8  ;;  %p68_p2 = scmp.lt.s32.totalorder %s62_s8, %s62_s8 }
   0x6   :  { %p69_p3 = por %p68_p2, %p67_p1 }
   0x8   :  { %p70_p4 = pnand %p69_p3, %p63_p0 }
   0xa   :  { %73 = shalt.err (!%p70_p4)
}
   0xb   :  { %17 = dma.hbm_to_vmem [thread:$0]  %s116_s0, 256, %s15_s7, [#allocation3]  }
   0xc   :  { %94 = dma.done.wait [#allocation3], 256  }
   0xd   :  { %95 = vsyncadd [#allocation3], 4294967040  ;;  %v21_v0 = vld [vmem:[#allocation2] sm:$0xff]  ;;  %v22_v1 = vld [vmem:[#allocation2 + $0x8] sm:$0xff]  ;;  %s99_s11 = smov [#allocation5]  }
   0xe   :  { %v23_v2 = vmul.f32 1.442695, %v21_v0  ;;  %v25_v3 = vmul.f32 1.442695, %v22_v1  ;;  %s39_s12 = sshll.u32 %s99_s11, 4  ;;  %s40_s12 = int_to_ptr.vmem [resolvable:$true] %s39_s12 }
   0xf   :  { %s74_s0 = scalar_lea.vmem %s40_s12, 256  ;;  %p79_p6 = scmp.lt.s32.totalorder %s40_s12, %s40_s12 }
  0x10   :  { %50 = vpow2.f32 %v23_v2  ;;  %p75_p5 = scmp.ne.s32.totalorder %s40_s12, %s74_s0  ;;  %p80_p7 = scmp.lt.s32.totalorder %s74_s0, %s74_s0 }
  0x11   :  { %52 = vpow2.f32 %v25_v3 }
  0x12   :  { %p81_p8 = por %p80_p7, %p79_p6 }
  0x14   :  { %p82_p9 = pnand %p81_p8, %p75_p5 }
  0x1d   :  { %v51_v4 = vpop.eup %50 }
  0x1e   :  { %v53_v5 = vpop.eup %52  ;;  %v27_v6 = vmax.f32 %v51_v4, 1e-05 }
  0x1f   :  { %v28_v7 = vmax.f32 %v53_v5, 1e-05 }
  0x20   :  { %v29_v8 = vmin.f32 %v27_v6, 1000000.0 }
  0x21   :  { %v30_v9 = vmin.f32 %v28_v7, 1000000.0 }
  0x22   :  { %31 = vst [vmem:[#allocation5] sm:$0xff] %v29_v8 }
  0x23   :  { %32 = vst [vmem:[#allocation5 + $0x8] sm:$0xff] %v30_v9 }
  0x24   :  { %85 = shalt.err (!%p82_p9)
}
  0x25   :  { %42 = dma.vmem_to_hbm [thread:$0]  %s40_s12, 256, %s117_s1, [#allocation4]  }
  0x26   :  { %96 = dma.done.wait [#allocation4], 256  }
  0x27   :  { %97 = vsyncadd [#allocation4], 4294967040 }
  0x28   :  { %46 = vsyncpa [#allocation3], 1 }
  0x29   :  { %47 = vsyncpa [#allocation4], 1 }

</bundles_post_ra>
